<compile_context>
chip_gen: v5e
topology: v5e:2x2
jax: 0.10.0
libtpu: 0.0.40
codegen_flags: <defaults>
</compile_context>

<pallas_src>
import functools

import jax
import jax.numpy as jnp
from jax.experimental import pallas as pl
from jax.experimental.pallas import tpu as pltpu


def _round_up(n: int, m: int) -> int:
    return (n + m - 1) // m * m


def final_layer_kernel(x_ref, t_ref, w_shift_ref, w_scale_ref, b_shift_ref,
                       b_scale_ref, w_lin_ref, b_lin_ref, o_ref, *, d_real: int):
    # ---- adaLN modulation: Linear(SiLU(t)) split into shift / scale halves ----
    t = t_ref[...].astype(jnp.float32)
    silu_t = (t * jax.nn.sigmoid(t)).astype(w_shift_ref.dtype)  # EUP sigmoid in f32
    shift = (jnp.dot(silu_t, w_shift_ref[...], preferred_element_type=jnp.float32)
             + b_shift_ref[...].astype(jnp.float32))
    scale = (jnp.dot(silu_t, w_scale_ref[...], preferred_element_type=jnp.float32)
             + b_scale_ref[...].astype(jnp.float32))

    # ---- LayerNorm (eps=1e-6, no affine), single-pass stats in f32 ----
    # Padded lanes of x are zero, so sums only see the real d_real lanes.
    x = x_ref[...].astype(jnp.float32)
    inv_d = jnp.float32(1.0 / d_real)
    mean = jnp.sum(x, axis=-1, keepdims=True) * inv_d
    mean_sq = jnp.sum(x * x, axis=-1, keepdims=True) * inv_d
    var = mean_sq - mean * mean
    xn = (x - mean) * jax.lax.rsqrt(var + 1e-6)

    # ---- modulate + final Linear ----
    # Padded lanes: shift=scale=0 there and w_lin rows are zero, so they contribute 0.
    y = (xn * (1.0 + scale) + shift).astype(w_lin_ref.dtype)
    out = (jnp.dot(y, w_lin_ref[...], preferred_element_type=jnp.float32)
           + b_lin_ref[...].astype(jnp.float32))
    o_ref[...] = out.astype(o_ref.dtype)


def final_layer(x, t, w_ada, b_ada, w_lin, b_lin, *, tile_b: int = 256):
    """FinalLayer forward (cond_method='adaln').

    x, t   : [B, D]
    w_ada  : [D, 2D]   (stored [in, out], adaLN Linear weight)
    b_ada  : [1, 2D]
    w_lin  : [D, OUT]  (stored [in, out])
    b_lin  : [1, OUT]
    returns: [B, OUT]
    """
    B, D = x.shape
    OUT = w_lin.shape[1]

    # Lane-dense padding: D and OUT up to multiples of 128; batch up to tile multiple.
    Dp = _round_up(D, 128)
    OUTp = _round_up(OUT, 128)
    tile_b = min(tile_b, _round_up(B, 8))
    Bp = _round_up(B, tile_b)

    xp = jnp.zeros((Bp, Dp), x.dtype).at[:B, :D].set(x)
    tp = jnp.zeros((Bp, Dp), t.dtype).at[:B, :D].set(t)

    # Split adaLN weight into tile-aligned shift/scale halves (matches chunk(2, -1)).
    w_shift = jnp.zeros((Dp, Dp), w_ada.dtype).at[:D, :D].set(w_ada[:, :D])
    w_scale = jnp.zeros((Dp, Dp), w_ada.dtype).at[:D, :D].set(w_ada[:, D:])
    b_shift = jnp.zeros((1, Dp), b_ada.dtype).at[:, :D].set(b_ada[:, :D])
    b_scale = jnp.zeros((1, Dp), b_ada.dtype).at[:, :D].set(b_ada[:, D:])
    w_lin_p = jnp.zeros((Dp, OUTp), w_lin.dtype).at[:D, :OUT].set(w_lin)
    b_lin_p = jnp.zeros((1, OUTp), b_lin.dtype).at[:, :OUT].set(b_lin)

    grid = (Bp // tile_b,)
    const = lambda i: (0, 0)          # weights: resident, DMA'd once
    batched = lambda i: (i, 0)        # x / t / out: tiled over batch

    elem_bytes = jnp.dtype(x.dtype).itemsize
    cost = pl.CostEstimate(
        flops=2 * Bp * (Dp * Dp * 2 + Dp * OUTp) + 10 * Bp * Dp,
        transcendentals=Bp * Dp + Bp,
        bytes_accessed=(2 * Bp * Dp + 2 * Dp * Dp + Dp * OUTp + Bp * OUTp) * elem_bytes,
    )

    kernel = functools.partial(final_layer_kernel, d_real=D)

    out_p = pl.pallas_call(
        kernel,
        out_shape=jax.ShapeDtypeStruct((Bp, OUTp), x.dtype),
        grid_spec=pltpu.PrefetchScalarGridSpec(
            num_scalar_prefetch=0,
            grid=grid,
            in_specs=[
                pl.BlockSpec((tile_b, Dp), batched),   # x
                pl.BlockSpec((tile_b, Dp), batched),   # t
                pl.BlockSpec((Dp, Dp), const),         # w_shift
                pl.BlockSpec((Dp, Dp), const),         # w_scale
                pl.BlockSpec((1, Dp), const),          # b_shift
                pl.BlockSpec((1, Dp), const),          # b_scale
                pl.BlockSpec((Dp, OUTp), const),       # w_lin
                pl.BlockSpec((1, OUTp), const),        # b_lin
            ],
            out_specs=pl.BlockSpec((tile_b, OUTp), batched),
        ),
        compiler_params=pltpu.CompilerParams(
            dimension_semantics=("parallel",),
            vmem_limit_bytes=64 * 1024 * 1024,
        ),
        cost_estimate=cost,
    )(xp, tp, w_shift, w_scale, b_shift, b_scale, w_lin_p, b_lin_p)

    return out_p[:B, :OUT]


def final_layer_ref(x, t, w_ada, b_ada, w_lin, b_lin):
    """Pure-JAX reference for correctness check."""
    x = x.astype(jnp.float32)
    t = t.astype(jnp.float32)
    D = x.shape[-1]
    silu_t = t * jax.nn.sigmoid(t)
    ada = silu_t @ w_ada.astype(jnp.float32) + b_ada.astype(jnp.float32)
    shift, scale = ada[:, :D], ada[:, D:]
    mean = jnp.mean(x, axis=-1, keepdims=True)
    var = jnp.mean((x - mean) ** 2, axis=-1, keepdims=True)
    xn = (x - mean) / jnp.sqrt(var + 1e-6)
    y = xn * (1.0 + scale) + shift
    return y @ w_lin.astype(jnp.float32) + b_lin.astype(jnp.float32)


if __name__ == "__main__":
    B, D, OUT = 8, 32, 16  # batch, model_channels, out_channels
    key = jax.random.PRNGKey(0)
    k1, k2, k3, k4, k5, k6 = jax.random.split(key, 6)

    x = jax.random.normal(k1, (B, D), dtype=jnp.float32)
    t = jax.random.normal(k2, (B, D), dtype=jnp.float32)

    # Deterministic synthetic parameters (adaLN_modulation Linear + final Linear)
    w_ada = jax.random.normal(k3, (D, 2 * D), dtype=jnp.float32) * 0.02
    b_ada = jax.random.normal(k4, (1, 2 * D), dtype=jnp.float32) * 0.02
    w_lin = jax.random.normal(k5, (D, OUT), dtype=jnp.float32) * 0.02
    b_lin = jax.random.normal(k6, (1, OUT), dtype=jnp.float32) * 0.02

    out = final_layer(x, t, w_ada, b_ada, w_lin, b_lin)
    out = jax.block_until_ready(out)

    ref = final_layer_ref(x, t, w_ada, b_ada, w_lin, b_lin)
    assert out.shape == (B, OUT)
    assert jnp.allclose(out, ref, atol=1e-4, rtol=1e-4), "mismatch vs reference"

    # TODO(synk): cond_method='concat' path (torch.cat([x, c], dim=-1)) not implemented;
    # default cond_method='adaln' is what is implemented here.
    print("KERNEL_OK")
</pallas_src>

<mosaic_0001>
module attributes {stable_mosaic.version = 11 : i64} {
  func.func @final_layer_kernel(%arg0: i32, %arg1: memref<8x128xf32, #tpu.memory_space<vmem>>, %arg2: memref<8x128xf32, #tpu.memory_space<vmem>>, %arg3: memref<128x128xf32, #tpu.memory_space<vmem>>, %arg4: memref<128x128xf32, #tpu.memory_space<vmem>>, %arg5: memref<1x128xf32, #tpu.memory_space<vmem>>, %arg6: memref<1x128xf32, #tpu.memory_space<vmem>>, %arg7: memref<128x128xf32, #tpu.memory_space<vmem>>, %arg8: memref<1x128xf32, #tpu.memory_space<vmem>>, %arg9: memref<8x128xf32, #tpu.memory_space<vmem>>) attributes {dimension_semantics = [#tpu.dimension_semantics<parallel>], iteration_bounds = array<i64: 1>, scalar_prefetch = 0 : i64, scratch_operands = 0 : i64, tpu.core_type = #tpu.core_type<tc>, window_params = [{transform_indices = @transform_0, window_bounds = array<i64: 8, 128>}, {transform_indices = @transform_1, window_bounds = array<i64: 8, 128>}, {pipeline_mode = #tpu.pipeline_mode<synchronous>, transform_indices = @transform_2, window_bounds = array<i64: 128, 128>}, {pipeline_mode = #tpu.pipeline_mode<synchronous>, transform_indices = @transform_3, window_bounds = array<i64: 128, 128>}, {pipeline_mode = #tpu.pipeline_mode<synchronous>, transform_indices = @transform_4, window_bounds = array<i64: 1, 128>}, {pipeline_mode = #tpu.pipeline_mode<synchronous>, transform_indices = @transform_5, window_bounds = array<i64: 1, 128>}, {pipeline_mode = #tpu.pipeline_mode<synchronous>, transform_indices = @transform_6, window_bounds = array<i64: 128, 128>}, {pipeline_mode = #tpu.pipeline_mode<synchronous>, transform_indices = @transform_7, window_bounds = array<i64: 1, 128>}, {transform_indices = @transform_8, window_bounds = array<i64: 8, 128>}]} {
    %c0 = arith.constant 0 : index
    %c0_0 = arith.constant 0 : index
    %0 = vector.load %arg2[%c0, %c0_0] : memref<8x128xf32, #tpu.memory_space<vmem>>, vector<8x128xf32>
    %1 = arith.negf %0 : vector<8x128xf32>
    %2 = math.exp %1 : vector<8x128xf32>
    %cst = arith.constant 1.000000e+00 : f32
    %3 = vector.broadcast %cst : f32 to vector<8x128xf32>
    %4 = arith.addf %3, %2 : vector<8x128xf32>
    %5 = arith.divf %3, %4 : vector<8x128xf32>
    %6 = arith.mulf %0, %5 : vector<8x128xf32>
    %c0_1 = arith.constant 0 : index
    %c0_2 = arith.constant 0 : index
    %7 = vector.load %arg3[%c0_1, %c0_2] : memref<128x128xf32, #tpu.memory_space<vmem>>, vector<128x128xf32>
    %cst_3 = arith.constant dense<0.000000e+00> : vector<8x128xf32>
    %8 = tpu.matmul %6, %7, %cst_3 {dimension_numbers = #tpu.dot_dimension_numbers<[1], [0], [0], [1], [0, 0, 1, 1], [], []>} : vector<8x128xf32>, vector<128x128xf32>, vector<8x128xf32> -> vector<8x128xf32>
    %c0_4 = arith.constant 0 : index
    %c0_5 = arith.constant 0 : index
    %9 = vector.load %arg5[%c0_4, %c0_5] : memref<1x128xf32, #tpu.memory_space<vmem>>, vector<1x128xf32>
    %10 = vector.broadcast %9 : vector<1x128xf32> to vector<8x128xf32>
    %11 = arith.addf %8, %10 : vector<8x128xf32>
    %c0_6 = arith.constant 0 : index
    %c0_7 = arith.constant 0 : index
    %12 = vector.load %arg4[%c0_6, %c0_7] : memref<128x128xf32, #tpu.memory_space<vmem>>, vector<128x128xf32>
    %cst_8 = arith.constant dense<0.000000e+00> : vector<8x128xf32>
    %13 = tpu.matmul %6, %12, %cst_8 {dimension_numbers = #tpu.dot_dimension_numbers<[1], [0], [0], [1], [0, 0, 1, 1], [], []>} : vector<8x128xf32>, vector<128x128xf32>, vector<8x128xf32> -> vector<8x128xf32>
    %c0_9 = arith.constant 0 : index
    %c0_10 = arith.constant 0 : index
    %14 = vector.load %arg6[%c0_9, %c0_10] : memref<1x128xf32, #tpu.memory_space<vmem>>, vector<1x128xf32>
    %15 = vector.broadcast %14 : vector<1x128xf32> to vector<8x128xf32>
    %16 = arith.addf %13, %15 : vector<8x128xf32>
    %c0_11 = arith.constant 0 : index
    %c0_12 = arith.constant 0 : index
    %17 = vector.load %arg1[%c0_11, %c0_12] : memref<8x128xf32, #tpu.memory_space<vmem>>, vector<8x128xf32>
    %cst_13 = arith.constant dense<0.000000e+00> : vector<8xf32>
    %18 = vector.multi_reduction <add>, %17, %cst_13 [1] : vector<8x128xf32> to vector<8xf32>
    %19 = vector.shape_cast %18 : vector<8xf32> to vector<8x1xf32>
    %cst_14 = arith.constant 3.125000e-02 : f32
    %20 = vector.broadcast %cst_14 : f32 to vector<8x1xf32>
    %21 = arith.mulf %19, %20 : vector<8x1xf32>
    %22 = arith.mulf %17, %17 : vector<8x128xf32>
    %cst_15 = arith.constant dense<0.000000e+00> : vector<8xf32>
    %23 = vector.multi_reduction <add>, %22, %cst_15 [1] : vector<8x128xf32> to vector<8xf32>
    %24 = vector.shape_cast %23 : vector<8xf32> to vector<8x1xf32>
    %cst_16 = arith.constant 3.125000e-02 : f32
    %25 = vector.broadcast %cst_16 : f32 to vector<8x1xf32>
    %26 = arith.mulf %24, %25 : vector<8x1xf32>
    %27 = arith.mulf %21, %21 : vector<8x1xf32>
    %28 = arith.subf %26, %27 : vector<8x1xf32>
    %29 = vector.broadcast %21 : vector<8x1xf32> to vector<8x128xf32>
    %30 = arith.subf %17, %29 : vector<8x128xf32>
    %cst_17 = arith.constant 9.99999997E-7 : f32
    %31 = vector.broadcast %cst_17 : f32 to vector<8x1xf32>
    %32 = arith.addf %28, %31 : vector<8x1xf32>
    %33 = math.rsqrt %32 : vector<8x1xf32>
    %34 = vector.broadcast %33 : vector<8x1xf32> to vector<8x128xf32>
    %35 = arith.mulf %30, %34 : vector<8x128xf32>
    %cst_18 = arith.constant 1.000000e+00 : f32
    %36 = vector.broadcast %cst_18 : f32 to vector<8x128xf32>
    %37 = arith.addf %36, %16 : vector<8x128xf32>
    %38 = arith.mulf %35, %37 : vector<8x128xf32>
    %39 = arith.addf %38, %11 : vector<8x128xf32>
    %c0_19 = arith.constant 0 : index
    %c0_20 = arith.constant 0 : index
    %40 = vector.load %arg7[%c0_19, %c0_20] : memref<128x128xf32, #tpu.memory_space<vmem>>, vector<128x128xf32>
    %cst_21 = arith.constant dense<0.000000e+00> : vector<8x128xf32>
    %41 = tpu.matmul %39, %40, %cst_21 {dimension_numbers = #tpu.dot_dimension_numbers<[1], [0], [0], [1], [0, 0, 1, 1], [], []>} : vector<8x128xf32>, vector<128x128xf32>, vector<8x128xf32> -> vector<8x128xf32>
    %c0_22 = arith.constant 0 : index
    %c0_23 = arith.constant 0 : index
    %42 = vector.load %arg8[%c0_22, %c0_23] : memref<1x128xf32, #tpu.memory_space<vmem>>, vector<1x128xf32>
    %43 = vector.broadcast %42 : vector<1x128xf32> to vector<8x128xf32>
    %44 = arith.addf %41, %43 : vector<8x128xf32>
    %c0_24 = arith.constant 0 : index
    %c0_25 = arith.constant 0 : index
    %45 = vector.load %arg9[%c0_24, %c0_25] : memref<8x128xf32, #tpu.memory_space<vmem>>, vector<8x128xf32>
    tpu.vector_store %arg9[%c0_24, %c0_25], %44 {strides = array<i32>} : memref<8x128xf32, #tpu.memory_space<vmem>>, vector<8x128xf32>,
    return
  }
  func.func @transform_0(%arg0: i32) -> (i32, i32) {
    %c0_i32 = arith.constant 0 : i32
    %c0_i32_0 = arith.constant 0 : i32
    return %arg0, %c0_i32 : i32, i32
  }
  func.func @transform_1(%arg0: i32) -> (i32, i32) {
    %c0_i32 = arith.constant 0 : i32
    %c0_i32_0 = arith.constant 0 : i32
    return %arg0, %c0_i32 : i32, i32
  }
  func.func @transform_2(%arg0: i32) -> (i32, i32) {
    %c0_i32 = arith.constant 0 : i32
    %c0_i32_0 = arith.constant 0 : i32
    %c0_i32_1 = arith.constant 0 : i32
    return %c0_i32, %c0_i32_0 : i32, i32
  }
  func.func @transform_3(%arg0: i32) -> (i32, i32) {
    %c0_i32 = arith.constant 0 : i32
    %c0_i32_0 = arith.constant 0 : i32
    %c0_i32_1 = arith.constant 0 : i32
    return %c0_i32, %c0_i32_0 : i32, i32
  }
  func.func @transform_4(%arg0: i32) -> (i32, i32) {
    %c0_i32 = arith.constant 0 : i32
    %c0_i32_0 = arith.constant 0 : i32
    %c0_i32_1 = arith.constant 0 : i32
    return %c0_i32, %c0_i32_0 : i32, i32
  }
  func.func @transform_5(%arg0: i32) -> (i32, i32) {
    %c0_i32 = arith.constant 0 : i32
    %c0_i32_0 = arith.constant 0 : i32
    %c0_i32_1 = arith.constant 0 : i32
    return %c0_i32, %c0_i32_0 : i32, i32
  }
  func.func @transform_6(%arg0: i32) -> (i32, i32) {
    %c0_i32 = arith.constant 0 : i32
    %c0_i32_0 = arith.constant 0 : i32
    %c0_i32_1 = arith.constant 0 : i32
    return %c0_i32, %c0_i32_0 : i32, i32
  }
  func.func @transform_7(%arg0: i32) -> (i32, i32) {
    %c0_i32 = arith.constant 0 : i32
    %c0_i32_0 = arith.constant 0 : i32
    %c0_i32_1 = arith.constant 0 : i32
    return %c0_i32, %c0_i32_0 : i32, i32
  }
  func.func @transform_8(%arg0: i32) -> (i32, i32) {
    %c0_i32 = arith.constant 0 : i32
    %c0_i32_0 = arith.constant 0 : i32
    return %arg0, %c0_i32 : i32, i32
  }
}

</mosaic_0001>

<bundles_post_ra>
// kernel: tpu_custom_call.1
= control target key start
LH: loop header
LB: loop body
LE: loop exit
PB: predicated region body
PF: predicated region fallthrough
CT: control target
= control target key end

     0   :  { %13 = vsyncpa [#allocation3], 0  ;;  %s547_s0 = inlined_call_operand.hbm [shape: f32[8,128], index: 0, kind: input, shape index: {}]   ;;  %s548_s1 = inlined_call_operand.hbm [shape: f32[8,128], index: 1, kind: input, shape index: {}]   ;;  %s549_s2 = inlined_call_operand.hbm [shape: f32[128,128], index: 2, kind: input, shape index: {}]   ;;  %s550_s3 = inlined_call_operand.hbm [shape: f32[128,128], index: 3, kind: input, shape index: {}]   ;;  %s551_s4 = inlined_call_operand.vmem [shape: f32[1,128], index: 4, kind: input, shape index: {}]   ;;  %s552_s5 = inlined_call_operand.vmem [shape: f32[1,128], index: 5, kind: input, shape index: {}]   ;;  %s553_s6 = inlined_call_operand.hbm [shape: f32[128,128], index: 6, kind: input, shape index: {}]   ;;  %s554_s7 = inlined_call_operand.vmem [shape: f32[1,128], index: 7, kind: input, shape index: {}]   ;;  %s555_s8 = inlined_call_operand.hbm [shape: f32[8,128], index: 8, kind: output, shape index: {}]  }
   0x1   :  { %14 = vsyncpa [#allocation6], 0 }
   0x2   :  { %15 = vsyncpa [#allocation9], 0  ;;  %s33_s29 = sshll.u32 %s548_s1, 4  ;;  %s34_s29 = int_to_ptr.hbm [resolvable:$true] %s33_s29 }
   0x3   :  { %16 = vsyncpa [#allocation4], 0  ;;  %s461_s30 = smov [#allocation5]   ;;  %s56_s12 = sshll.u32 %s550_s3, 4  ;;  %s57_s12 = int_to_ptr.hbm [resolvable:$true] %s56_s12 }
   0x4   :  { %s35_s9 = sshll.u32 %s461_s30, 4  ;;  %s462_s13 = smov [#allocation8]   ;;  %s36_s9 = int_to_ptr.vmem [resolvable:$true] %s35_s9 }
   0x5   :  { %38 = dma.hbm_to_vmem [thread:$0]  %s34_s29, 128, %s36_s9, [#allocation6]  }
   0x6   :  { %s58_s14 = sshll.u32 %s462_s13, 4  ;;  %s22_s17 = sshll.u32 %s547_s0, 4  ;;  %s59_s14 = int_to_ptr.vmem [resolvable:$true] %s58_s14  ;;  %s23_s17 = int_to_ptr.hbm [resolvable:$true] %s22_s17 }
   0x7   :  { %s463_s1 = smov 128   ;;  %s464_s18 = smov 8  }
   0x8   :  { %64 = dma.hbm_to_vmem [thread:$0]  %s57_s12, 2048, %s59_s14, [#allocation9], %s463_s1, %s463_s1, %s464_s18  }
   0x9   :  { %s43_s21 = sshll.u32 %s549_s2, 4  ;;  %s465_s22 = smov [#allocation2]   ;;  %s44_s21 = int_to_ptr.hbm [resolvable:$true] %s43_s21 }
   0xa   :  { %s24_s23 = sshll.u32 %s465_s22, 4  ;;  %s466_s3 = smov [#allocation7]   ;;  %s25_s23 = int_to_ptr.vmem [resolvable:$true] %s24_s23 }
   0xb   :  { %27 = dma.hbm_to_vmem [thread:$0]  %s23_s17, 128, %s25_s23, [#allocation3]  }
   0xc   :  { %s45_s24 = sshll.u32 %s466_s3, 4  ;;  %s73_s0 = sshll.u32 %s553_s6, 4  ;;  %s46_s24 = int_to_ptr.vmem [resolvable:$true] %s45_s24  ;;  %s74_s0 = int_to_ptr.hbm [resolvable:$true] %s73_s0 }
   0xd   :  { %51 = dma.hbm_to_vmem [thread:$0]  %s44_s21, 2048, %s46_s24, [#allocation6], %s463_s1, %s463_s1, %s464_s18  }
   0xe   :  { %s467_s27 = smov [#allocation10]  }
   0xf   :  { %s75_s28 = sshll.u32 %s467_s27, 4  ;;  %s76_s28 = int_to_ptr.vmem [resolvable:$true] %s75_s28 }
  0x10   :  { %81 = dma.hbm_to_vmem [thread:$0]  %s74_s0, 2048, %s76_s28, [#allocation9], %s463_s1, %s463_s1, %s464_s18  }
  0x11   :  { %453 = dma.done.wait [#allocation3], 128  }
  0x12   :  { %454 = vsyncadd [#allocation3], 4294967168 }
  0x13   :  { %455 = dma.done.wait [#allocation6], 2176  }
  0x14   :  { %456 = vsyncadd [#allocation6], 4294965120 }
  0x15   :  { %457 = dma.done.wait [#allocation9], 4096  }
  0x16   :  { %458 = vsyncadd [#allocation9], 4294963200  ;;  %v529_v0 = vld [vmem:[#allocation2] sm:$0xff]  ;;  %v180_v1 = vld [vmem:[#allocation8 + $0x78] sm:$0xff]  ;;  %s468_s10 = smov [#allocation11]   ;;  %s279_s13 = sshll.u32 %s555_s8, 4  ;;  %s280_s13 = int_to_ptr.hbm [resolvable:$true] %s279_s13 }
  0x17   :  { %v179_v2 = vld [vmem:[#allocation8 + $0x70] sm:$0xff]  ;;  %206 = vadd.xlane.f32.xlu0 %v529_v0  ;;  %185 = vmatpush.msra.mxu1 %v180_v1  ;;  %v140_v3 = vld [vmem:[#allocation7 + $0x78] sm:$0xff]  ;;  %v178_v5 = vld [vmem:[#allocation8 + $0x68] sm:$0xff]  ;;  %v209_v8 = vmul.f32 %v529_v0, %v529_v0  ;;  %s277_s11 = sshll.u32 %s468_s10, 4  ;;  %s278_s11 = int_to_ptr.vmem [resolvable:$true] %s277_s11 }
  0x18   :  { %v139_v4 = vld [vmem:[#allocation7 + $0x70] sm:$0xff]  ;;  %145 = vmatpush.msra.mxu0 %v140_v3  ;;  %v138_v6 = vld [vmem:[#allocation7 + $0x68] sm:$0xff]  ;;  %v177_v7 = vld [vmem:[#allocation8 + $0x60] sm:$0xff] }
  0x19   :  { %186 = vmatpush.msra.mxu1 %v179_v2  ;;  %v137_v9 = vld [vmem:[#allocation7 + $0x60] sm:$0xff]  ;;  %v176_v10 = vld [vmem:[#allocation8 + $0x58] sm:$0xff]  ;;  %v175_v12 = vld [vmem:[#allocation8 + $0x50] sm:$0xff] }
  0x1a   :  { %146 = vmatpush.msra.mxu0 %v139_v4  ;;  %v136_v11 = vld [vmem:[#allocation7 + $0x58] sm:$0xff]  ;;  %v135_v13 = vld [vmem:[#allocation7 + $0x50] sm:$0xff]  ;;  %v174_v14 = vld [vmem:[#allocation8 + $0x48] sm:$0xff] }
  0x1b   :  { %187 = vmatpush.msra.mxu1 %v178_v5  ;;  %v104_v15 = vld [vmem:[#allocation5] sm:$0xff]  ;;  %v134_v16 = vld [vmem:[#allocation7 + $0x48] sm:$0xff]  ;;  %v173_v18 = vld [vmem:[#allocation8 + $0x40] sm:$0xff] }
  0x1c   :  { %147 = vmatpush.msra.mxu0 %v138_v6  ;;  %v291_v17 = vmul.f32 -1.442695, %v104_v15  ;;  %v133_v19 = vld [vmem:[#allocation7 + $0x40] sm:$0xff]  ;;  %v172_v20 = vld [vmem:[#allocation8 + $0x38] sm:$0xff]  ;;  %v171_v22 = vld [vmem:[#allocation8 + $0x30] sm:$0xff] }
  0x1d   :  { %188 = vmatpush.msra.mxu1 %v177_v7  ;;  %v132_v21 = vld [vmem:[#allocation7 + $0x38] sm:$0xff]  ;;  %v131_v23 = vld [vmem:[#allocation7 + $0x30] sm:$0xff]  ;;  %v170_v24 = vld [vmem:[#allocation8 + $0x28] sm:$0xff] }
  0x1e   :  { %148 = vmatpush.msra.mxu0 %v137_v9  ;;  %303 = vpow2.f32 %v291_v17  ;;  %v130_v26 = vld [vmem:[#allocation7 + $0x28] sm:$0xff]  ;;  %v169_v27 = vld [vmem:[#allocation8 + $0x20] sm:$0xff]  ;;  %v168_v30 = vld [vmem:[#allocation8 + $0x18] sm:$0xff] }
  0x1f   :  { %210 = vadd.xlane.f32.xlu0 %v209_v8  ;;  %189 = vmatpush.msra.mxu1 %v176_v10  ;;  %v129_v29 = vld [vmem:[#allocation7 + $0x20] sm:$0xff]  ;;  %v128_v31 = vld [vmem:[#allocation7 + $0x18] sm:$0xff]  ;;  %v167_v32 = vld [vmem:[#allocation8 + $0x10] sm:$0xff] }
  0x20   :  { %149 = vmatpush.msra.mxu0 %v136_v11  ;;  %v127_v33 = vld [vmem:[#allocation7 + $0x10] sm:$0xff]  ;;  %v166_v34 = vld [vmem:[#allocation8 + $0x8] sm:$0xff]  ;;  %v165_v37 = vld [vmem:[#allocation8] sm:$0xff] }
  0x21   :  { %190 = vmatpush.msra.mxu1 %v175_v12  ;;  %v126_v35 = vld [vmem:[#allocation7 + $0x8] sm:$0xff]  ;;  %v125_v39 = vld [vmem:[#allocation7] sm:$0xff]  ;;  %v246_v49 = vld [vmem:[#allocation10 + $0x78] sm:$0xff] }
  0x22   :  { %150 = vmatpush.msra.mxu0 %v135_v13  ;;  %251 = vmatpush.msra.mxu2 %v246_v49  ;;  %v245_v50 = vld [vmem:[#allocation10 + $0x70] sm:$0xff]  ;;  %v244_v51 = vld [vmem:[#allocation10 + $0x68] sm:$0xff]  ;;  %v243_v52 = vld [vmem:[#allocation10 + $0x60] sm:$0xff] }
  0x23   :  { %191 = vmatpush.msra.mxu1 %v174_v14  ;;  %v242_v54 = vld [vmem:[#allocation10 + $0x58] sm:$0xff]  ;;  %v241_v55 = vld [vmem:[#allocation10 + $0x50] sm:$0xff]  ;;  %v240_v57 = vld [vmem:[#allocation10 + $0x48] sm:$0xff] }
  0x24   :  { %151 = vmatpush.msra.mxu0 %v134_v16  ;;  %v304_v25 = vpop.eup %303  ;;  %252 = vmatpush.msra.mxu2 %v245_v50  ;;  %v239_v58 = vld [vmem:[#allocation10 + $0x40] sm:$0xff]  ;;  %v238_v62 = vld [vmem:[#allocation10 + $0x38] sm:$0xff]  ;;  %v237_v63 = vld [vmem:[#allocation10 + $0x30] sm:$0xff] }
  0x25   :  { %192 = vmatpush.msra.mxu1 %v173_v18  ;;  %v108_v28 = vadd.f32 1.0, %v304_v25  ;;  %v236_v2 = vld [vmem:[#allocation10 + $0x28] sm:$0xff]  ;;  %v235_v4 = vld [vmem:[#allocation10 + $0x20] sm:$0xff]  ;;  %v234_v5 = vld [vmem:[#allocation10 + $0x18] sm:$0xff] }
  0x26   :  { %152 = vmatpush.msra.mxu0 %v133_v19  ;;  %253 = vmatpush.msra.mxu2 %v244_v51  ;;  %v233_v6 = vld [vmem:[#allocation10 + $0x10] sm:$0xff]  ;;  %v232_v7 = vld [vmem:[#allocation10 + $0x8] sm:$0xff]  ;;  %v231_v8 = vld [vmem:[#allocation10] sm:$0xff] }
  0x27   :  { %193 = vmatpush.msra.mxu1 %v172_v20  ;;  %305 = vrcp.f32 %v108_v28  ;;  %v120_v40 = vand.u32 2147483648, %v108_v28  ;;  %vm114_vm0 = vweird.f32 %v108_v28  ;;  %v118_v42 = vand.u32 2147483647, %v108_v28  ;;  %v301_v16 = vld [vmem:[%s551_s4] ss:$0 sm:$0xff] }
  0x28   :  { %153 = vmatpush.msra.mxu0 %v132_v21  ;;  %254 = vmatpush.msra.mxu2 %v243_v52 }
  0x29   :  { %194 = vmatpush.msra.mxu1 %v171_v22  ;;  %v121_v44 = vor.u32 1.1754944e-38, %v120_v40  ;;  %vm119_vm3 = vcmp.eq.f32.partialorder %v118_v42, 8.507059e+37 }
  0x2a   :  { %154 = vmatpush.msra.mxu0 %v131_v23  ;;  %255 = vmatpush.msra.mxu2 %v242_v54 }
  0x2b   :  { %195 = vmatpush.msra.mxu1 %v170_v24 }
  0x2c   :  { %155 = vmatpush.msra.mxu0 %v130_v26  ;;  %256 = vmatpush.msra.mxu2 %v241_v55 }
  0x2d   :  { %196 = vmatpush.msra.mxu1 %v169_v27  ;;  %v306_v36 = vpop.eup %305  ;;  %v302_v27 = vld [vmem:[%s554_s7] ss:$0 sm:$0xff] }
  0x2e   :  { %156 = vmatpush.msra.mxu0 %v129_v29  ;;  %v110_v38 = vmul.f32 %v306_v36, %v108_v28  ;;  %vm115_vm1 = vweird.f32 %v306_v36  ;;  %257 = vmatpush.msra.mxu2 %v240_v57 }
  0x2f   :  { %197 = vmatpush.msra.mxu1 %v168_v30  ;;  %vm116_vm2 = vmor %vm114_vm0, %vm115_vm1 }
  0x30   :  { %157 = vmatpush.msra.mxu0 %v128_v31  ;;  %v111_v41 = vsub.f32 1.0, %v110_v38  ;;  %258 = vmatpush.msra.mxu2 %v239_v58 }
  0x31   :  { %198 = vmatpush.msra.mxu1 %v167_v32 }
  0x32   :  { %158 = vmatpush.msra.mxu0 %v127_v33  ;;  %v112_v43 = vmul.f32 %v306_v36, %v111_v41  ;;  %259 = vmatpush.msra.mxu2 %v238_v62 }
  0x33   :  { %199 = vmatpush.msra.mxu1 %v166_v34 }
  0x34   :  { %159 = vmatpush.msra.mxu0 %v126_v35  ;;  %v113_v45 = vadd.f32 %v306_v36, %v112_v43  ;;  %260 = vmatpush.msra.mxu2 %v237_v63 }
  0x35   :  { %200 = vmatpush.msra.mxu1 %v165_v37 }
  0x36   :  { %160 = vmatpush.msra.mxu0 %v125_v39  ;;  %v117_v46 = vsel %vm116_vm2, %v306_v36, %v113_v45  ;;  %261 = vmatpush.msra.mxu2 %v236_v2 }
  0x37   :  { %v122_v47 = vsel %vm119_vm3, %v121_v44, %v117_v46 }
  0x38   :  { %v124_v48 = vmul.f32 %v122_v47, %v104_v15  ;;  %262 = vmatpush.msra.mxu2 %v235_v4  ;;  %v300_v15 = vld [vmem:[%s552_s5] ss:$0 sm:$0xff] }
  0x3a   :  { %201 = vmatmul.f32.vlgmr.msra.gmra.mxu1 %v124_v48  ;;  %161 = vmatmul.f32.vlgmr.msra.gmra.mxu0 %v124_v48 }
  0x3b   :  { %263 = vmatpush.msra.mxu2 %v234_v5 }
  0x3d   :  { %264 = vmatpush.msra.mxu2 %v233_v6 }
  0x3f   :  { %265 = vmatpush.msra.mxu2 %v232_v7 }
  0x41   :  { %266 = vmatpush.msra.mxu2 %v231_v8 }
  0x8a   :  { %v207_v53 = vpop.xlane.xlu0 %206 }
  0x8b   :  { %v208_v56 = vmul.f32 0.03125, %v207_v53 }
  0x8d   :  { %v213_v60 = vmul.f32 %v208_v56, %v208_v56  ;;  %v215_v20 = vsub.f32 %v529_v0, %v208_v56 }
  0x92   :  { %v211_v59 = vpop.xlane.xlu0 %210 }
  0x93   :  { %v212_v61 = vmul.f32 0.03125, %v211_v59 }
  0x95   :  { %v214_v1 = vsub.f32 %v212_v61, %v213_v60 }
  0x97   :  { %v216_v3 = vadd.f32 1e-06, %v214_v1 }
  0x99   :  { %307 = vrsqrt.f32 %v216_v3  ;;  %vm223_vm5 = vweird.f32 %v216_v3 }
  0x9f   :  { %v308_v9 = vpop.eup %307 }
  0xa0   :  { %v218_v10 = vmul.f32 %v308_v9, %v216_v3  ;;  %vm224_vm4 = vweird.f32 %v308_v9 }
  0xa1   :  { %vm225_vm6 = vmor %vm223_vm5, %vm224_vm4 }
  0xa2   :  { %v219_v11 = vmul.f32 %v308_v9, %v218_v10 }
  0xa4   :  { %v220_v12 = vmul.f32 0.5, %v219_v11 }
  0xa6   :  { %v221_v13 = vsub.f32 1.5, %v220_v12 }
  0xa8   :  { %v222_v14 = vmul.f32 %v308_v9, %v221_v13 }
  0xaa   :  { %v226_v18 = vsel %vm225_vm6, %v308_v9, %v222_v14 }
  0xab   :  { %v227_v22 = vmul.f32 %v226_v18, %v215_v20 }
  0xb7   :  { %v202_v17 = vpop.f32.mrf.mxu1  ;;  %v162_v19 = vpop.f32.mrf.mxu0 }
  0xb8   :  { %v203_v21 = vadd.f32 %v300_v15, %v202_v17  ;;  %v163_v24 = vadd.f32 %v301_v16, %v162_v19 }
  0xba   :  { %v228_v23 = vadd.f32 1.0, %v203_v21 }
  0xbc   :  { %v229_v25 = vmul.f32 %v228_v23, %v227_v22 }
  0xbe   :  { %v230_v26 = vadd.f32 %v229_v25, %v163_v24 }
  0xc0   :  { %267 = vmatmul.f32.vlgmr.msra.gmra.mxu2 %v230_v26 }
 0x143   :  { %v268_v28 = vpop.f32.mrf.mxu2 }
 0x144   :  { %v269_v29 = vadd.f32 %v302_v27, %v268_v28 }
 0x146   :  { %271 = vst [vmem:[#allocation11] sm:$0xff] %v269_v29 }
 0x147   :  { %282 = dma.vmem_to_hbm [thread:$0]  %s278_s11, 128, %s280_s13, [#allocation4]  }
 0x148   :  { %459 = dma.done.wait [#allocation4], 128  }
 0x149   :  { %460 = vsyncadd [#allocation4], 4294967168 }
 0x14a   :  { %287 = vsyncpa [#allocation3], 1 }
 0x14b   :  { %288 = vsyncpa [#allocation6], 1 }
 0x14c   :  { %289 = vsyncpa [#allocation9], 1 }
 0x14d   :  { %290 = vsyncpa [#allocation4], 1 }

</bundles_post_ra>
